<compile_context>
chip_gen: v7x
topology: tpu7x:2x2x1
jax: 0.10.0
libtpu: 0.0.40
codegen_flags: <defaults>
</compile_context>

<pallas_src>
import functools

import jax
import jax.numpy as jnp
from jax.experimental import pallas as pl
from jax.experimental.pallas import tpu as pltpu


def _hloss_kernel(x_ref, o_ref, *, hw, tile_r, mask_last):
    t = pl.program_id(1)

    # Per-batch resident accumulator: zero it on the first tile of each batch.
    @pl.when(t == 0)
    def _():
        o_ref[...] = jnp.zeros_like(o_ref)

    x = x_ref[0]                                      # (C, tile_r, 128)
    if x.dtype == jnp.bfloat16:
        # Packed bf16 max/sub on the VPU, widen only for exp / accumulation.
        m = jnp.max(x, axis=0)                        # (tile_r, 128) bf16
        xm = (x - m[None, :, :]).astype(jnp.float32)  # (C, tile_r, 128) f32
    else:
        xf = x.astype(jnp.float32)
        m = jnp.max(xf, axis=0)                       # (tile_r, 128)
        xm = xf - m[None, :, :]                       # (C, tile_r, 128)

    e = jnp.exp(xm)                                   # EUP; only per-element transcendental
    s = jnp.sum(e, axis=0)                            # (tile_r, 128)
    num = jnp.sum(e * xm, axis=0)                     # (tile_r, 128)

    # -sum_c p_c log p_c == log(s) - (1/s) * sum_c e_c * (x_c - m)
    # EUP approx reciprocal + one Newton step -> ~full f32 precision, per column.
    r = pl.reciprocal(s, approx=True)
    r = r * (2.0 - s * r)
    ent = jnp.log(s) - num * r                        # (tile_r, 128)

    def _accumulate(vals):
        if tile_r % 8 == 0:
            # (tile_r,128)->(tile_r//8,8,128) matches vreg tiling: VPU add ladder.
            partial = jnp.sum(vals.reshape(tile_r // 8, 8, 128), axis=0)  # (8,128)
        else:
            # Single small tile (tile_r == full R, not a multiple of 8):
            # sublane-reduce and place the row sum into row 0 of the slab.
            vsum = jnp.sum(vals, axis=0, keepdims=True)                   # (1,128)
            row = jax.lax.broadcasted_iota(jnp.int32, (8, 128), 0)
            partial = jnp.where(row == 0, vsum, 0.0)                      # (8,128)
        o_ref[...] += partial[None]

    if mask_last:
        last = pl.num_programs(1) - 1

        @pl.when(t == last)
        def _():
            base = t * (tile_r * 128)
            r_idx = jax.lax.broadcasted_iota(jnp.int32, (tile_r, 128), 0)
            l_idx = jax.lax.broadcasted_iota(jnp.int32, (tile_r, 128), 1)
            col = base + r_idx * 128 + l_idx
            _accumulate(jnp.where(col < hw, ent, 0.0))

        @pl.when(t != last)
        def _():
            _accumulate(ent)
    else:
        _accumulate(ent)


def hloss(x, *, vmem_budget_bytes=40 * 1024 * 1024):
    """x: NCHW array. Returns scalar -sum(softmax(x,1) * log_softmax(x,1))."""
    n, c, h, w = x.shape
    hw = h * w
    itemsize = jnp.dtype(x.dtype).itemsize

    # Lane-folded spatial rows of 128.
    r_full = -(-hw // 128)
    hw128 = r_full * 128

    # Dtype-aware sublane packing: 8 (f32) / 16 (bf16) / 32 (int8 / fp8).
    packing = 8 * max(1, 4 // itemsize)

    # Rows per tile from the VMEM budget: 2x double-buffered input block plus
    # ~4 f32-sized elementwise temporaries (x, x-m, exp, e*xm) per element row.
    per_row_bytes = c * 128 * (2 * itemsize + 4 * 4)
    tile_r = max(packing, (vmem_budget_bytes // per_row_bytes) // packing * packing)
    if tile_r >= r_full:
        tile_r = r_full            # single tile: full-dim block, any row count OK
        num_tiles = 1
    else:
        num_tiles = -(-r_full // tile_r)

    # Masking is only needed on the last tile, and only if the tiles overhang hw.
    mask_last = (num_tiles * tile_r * 128) != hw

    x3 = x.reshape(n, c, hw)
    if hw128 != hw:
        # TODO(synk): ragged-HW slow path — replace this full-tensor pad copy with
        # manual memory_space=pl.ANY DMAs of lane-aligned windows into VMEM scratch.
        x3 = jnp.pad(x3, ((0, 0), (0, 0), (0, hw128 - hw)))
    x4 = x3.reshape(n, c, r_full, 128)

    # VMEM limit from actual usage (double-buffered input + f32 temps + headroom),
    # kept well inside v7x's 64 MiB physical VMEM.
    block_in = c * tile_r * 128 * itemsize
    block_f32 = c * tile_r * 128 * 4
    vmem_limit = int(min(max(2 * block_in + 4 * block_f32 + (2 << 20), 8 << 20),
                         48 << 20))

    kernel = functools.partial(
        _hloss_kernel, hw=hw, tile_r=tile_r, mask_last=mask_last
    )

    out = pl.pallas_call(
        kernel,
        out_shape=jax.ShapeDtypeStruct((n, 8, 128), jnp.float32),
        grid_spec=pltpu.PrefetchScalarGridSpec(
            num_scalar_prefetch=0,
            grid=(n, num_tiles),
            in_specs=[
                pl.BlockSpec((1, c, tile_r, 128), lambda i, t: (i, 0, t, 0)),
            ],
            # Per-batch resident lane-dense accumulator (no cross-core races).
            out_specs=pl.BlockSpec((1, 8, 128), lambda i, t: (i, 0, 0)),
        ),
        compiler_params=pltpu.CompilerParams(
            # Batch axis parallel (v7x megacore); tile axis is the reduction.
            # TODO(synk): if n == 1 is common, split num_tiles over a leading
            # parallel axis of size 2 with per-half output rows instead.
            dimension_semantics=("parallel", "arbitrary"),
            vmem_limit_bytes=vmem_limit,
        ),
    )(x4)
    return jnp.sum(out)


if __name__ == "__main__":
    key = jax.random.PRNGKey(0)
    x = jax.random.normal(key, (2, 4, 16, 16), dtype=jnp.float32)  # NCHW

    result = hloss(x)
    jax.block_until_ready(result)

    # Reference check in plain JAX (same math as torch F.softmax * F.log_softmax).
    p = jax.nn.softmax(x, axis=1)
    ref = -jnp.sum(p * jax.nn.log_softmax(x, axis=1))
    assert jnp.allclose(result, ref, rtol=1e-4, atol=1e-4), (result, ref)

    print("KERNEL_OK")
</pallas_src>

<mosaic_0001>
module attributes {stable_mosaic.version = 11 : i64} {
  func.func @_hloss_kernel(%arg0: i32, %arg1: i32, %arg2: memref<1x4x2x128xf32, #tpu.memory_space<vmem>>, %arg3: memref<1x8x128xf32, #tpu.memory_space<vmem>>) attributes {dimension_semantics = [#tpu.dimension_semantics<parallel>, #tpu.dimension_semantics<arbitrary>], iteration_bounds = array<i64: 2, 1>, scalar_prefetch = 0 : i64, scratch_operands = 0 : i64, tpu.core_type = #tpu.core_type<tc>, window_params = [{transform_indices = @transform_0, window_bounds = array<i64: 1, 4, 2, 128>}, {transform_indices = @transform_1, window_bounds = array<i64: 1, 8, 128>}]} {
    %c0_i32 = arith.constant 0 : i32
    %0 = arith.cmpi eq, %arg1, %c0_i32 : i32
    %1 = arith.extui %0 : i1 to i32
    %c0_i32_0 = arith.constant 0 : i32
    %2 = arith.cmpi ne, %1, %c0_i32_0 : i32
    scf.if %2 {
      %cst_16 = arith.constant 0.000000e+00 : f32
      %34 = vector.broadcast %cst_16 : f32 to vector<1x8x128xf32>
      %c0_17 = arith.constant 0 : index
      %c0_18 = arith.constant 0 : index
      %c0_19 = arith.constant 0 : index
      %35 = vector.load %arg3[%c0_17, %c0_18, %c0_19] : memref<1x8x128xf32, #tpu.memory_space<vmem>>, vector<1x8x128xf32>
      tpu.vector_store %arg3[%c0_17, %c0_18, %c0_19], %34 {strides = array<i32>} : memref<1x8x128xf32, #tpu.memory_space<vmem>>, vector<1x8x128xf32>,
    } else {
    }
    %c0 = arith.constant 0 : index
    %c0_1 = arith.constant 0 : index
    %c0_2 = arith.constant 0 : index
    %c0_3 = arith.constant 0 : index
    %3 = vector.load %arg2[%c0, %c0_1, %c0_2, %c0_3] : memref<1x4x2x128xf32, #tpu.memory_space<vmem>>, vector<1x4x2x128xf32>
    %4 = vector.shape_cast %3 : vector<1x4x2x128xf32> to vector<4x2x128xf32>
    %cst = arith.constant dense<0xFF800000> : vector<2x128xf32>
    %5 = vector.multi_reduction <maximumf>, %4, %cst [0] : vector<4x2x128xf32> to vector<2x128xf32>
    %6 = vector.shape_cast %5 : vector<2x128xf32> to vector<1x2x128xf32>
    %7 = vector.broadcast %6 : vector<1x2x128xf32> to vector<4x2x128xf32>
    %8 = arith.subf %4, %7 : vector<4x2x128xf32>
    %9 = math.exp %8 : vector<4x2x128xf32>
    %cst_4 = arith.constant dense<0.000000e+00> : vector<2x128xf32>
    %10 = vector.multi_reduction <add>, %9, %cst_4 [0] : vector<4x2x128xf32> to vector<2x128xf32>
    %11 = arith.mulf %9, %8 : vector<4x2x128xf32>
    %cst_5 = arith.constant dense<0.000000e+00> : vector<2x128xf32>
    %12 = vector.multi_reduction <add>, %11, %cst_5 [0] : vector<4x2x128xf32> to vector<2x128xf32>
    %13 = tpu.reciprocal %10 {approx = true} : vector<2x128xf32> -> vector<2x128xf32>
    %14 = arith.mulf %10, %13 : vector<2x128xf32>
    %cst_6 = arith.constant 2.000000e+00 : f32
    %15 = vector.broadcast %cst_6 : f32 to vector<2x128xf32>
    %16 = arith.subf %15, %14 : vector<2x128xf32>
    %17 = arith.mulf %13, %16 : vector<2x128xf32>
    %18 = math.log %10 : vector<2x128xf32>
    %19 = arith.mulf %12, %17 : vector<2x128xf32>
    %20 = arith.subf %18, %19 : vector<2x128xf32>
    %cst_7 = arith.constant dense<0.000000e+00> : vector<128xf32>
    %21 = vector.multi_reduction <add>, %20, %cst_7 [0] : vector<2x128xf32> to vector<128xf32>
    %22 = vector.shape_cast %21 : vector<128xf32> to vector<1x128xf32>
    %23 = tpu.iota {dimensions = array<i32: 0>} : vector<8x128xi32>
    %c0_i32_8 = arith.constant 0 : i32
    %24 = vector.broadcast %c0_i32_8 : i32 to vector<8x128xi32>
    %25 = arith.cmpi eq, %23, %24 : vector<8x128xi32>
    %cst_9 = arith.constant 0.000000e+00 : f32
    %26 = vector.shape_cast %22 : vector<1x128xf32> to vector<1x128xf32>
    %27 = vector.broadcast %26 : vector<1x128xf32> to vector<8x128xf32>
    %28 = vector.broadcast %cst_9 : f32 to vector<8x128xf32>
    %29 = arith.select %25, %27, %28 : vector<8x128xi1>, vector<8x128xf32>
    %c0_10 = arith.constant 0 : index
    %c0_11 = arith.constant 0 : index
    %c0_12 = arith.constant 0 : index
    %30 = vector.load %arg3[%c0_10, %c0_11, %c0_12] : memref<1x8x128xf32, #tpu.memory_space<vmem>>, vector<1x8x128xf32>
    %31 = vector.shape_cast %29 : vector<8x128xf32> to vector<1x8x128xf32>
    %32 = arith.addf %30, %31 : vector<1x8x128xf32>
    %c0_13 = arith.constant 0 : index
    %c0_14 = arith.constant 0 : index
    %c0_15 = arith.constant 0 : index
    %33 = vector.load %arg3[%c0_13, %c0_14, %c0_15] : memref<1x8x128xf32, #tpu.memory_space<vmem>>, vector<1x8x128xf32>
    tpu.vector_store %arg3[%c0_13, %c0_14, %c0_15], %32 {strides = array<i32>} : memref<1x8x128xf32, #tpu.memory_space<vmem>>, vector<1x8x128xf32>,
    return
  }
  func.func @transform_0(%arg0: i32, %arg1: i32) -> (i32, i32, i32, i32) {
    %c0_i32 = arith.constant 0 : i32
    %c0_i32_0 = arith.constant 0 : i32
    %c0_i32_1 = arith.constant 0 : i32
    return %arg0, %c0_i32, %arg1, %c0_i32_0 : i32, i32, i32, i32
  }
  func.func @transform_1(%arg0: i32, %arg1: i32) -> (i32, i32, i32) {
    %c0_i32 = arith.constant 0 : i32
    %c0_i32_0 = arith.constant 0 : i32
    %c0_i32_1 = arith.constant 0 : i32
    return %arg0, %c0_i32, %c0_i32_0 : i32, i32, i32
  }
}

</mosaic_0001>

<bundles_post_ra>
// kernel: tpu_custom_call.1
= control target key start
LH: loop header
LB: loop body
LE: loop exit
PB: predicated region body
PF: predicated region fallthrough
CT: control target
= control target key end

     0   :  { %6 = vsyncpa [#allocation3], 0  ;;  %s723_s0 = inlined_call_operand.hbm [shape: f32[2,4,2,128], index: 0, kind: input, shape index: {}]   ;;  %s724_s1 = inlined_call_operand.hbm [shape: f32[2,8,128], index: 1, kind: output, shape index: {}]  }
   0x1   :  { %8 = vsyncpa [#allocation3 + $0x1], 0 }
   0x2   :  { %9 = vsyncpa [#allocation4], 0 }
   0x3   :  { %11 = vsyncpa [#allocation4 + $0x1], 0  ;;  %s533_s6 = smov 0   ;;  %s535_s7 = smov 0  }
   0x4   :  { %s537_s8 = smov 0   ;;  %s539_s9 = smov 0  }
   0x5   :  { %s541_s10 = smov 0   ;;  %s543_s11 = smov 0  }
   0x6 LB: > { %s313_s12 = sadd.s32 4294967295, %s517_s11   ;;  %s314_s13 = sadd.s32 4294967294, %s517_s11   ;;  %s517_s11 = sphi %s543_s11, %s17_s11   ;;  %s513_s10 = sphi %s541_s10, %s739_s10   ;;  %s509_s9 = sphi %s539_s9, %s738_s9   ;;  %s505_s8 = sphi %s537_s8, %s737_s8   ;;  %s501_s7 = sphi %s535_s7, %s736_s7   ;;  %s497_s6 = sphi %s533_s6, %s735_s6  }
   0x7   : > { %s29_s14 = sadd.s32 1, %s513_s10  ;;  %s38_s15 = sadd.s32 1, %s505_s8 }
   0x8   : > { %p31_p0 = scmp.ge.s32.totalorder %s29_s14, 2  ;;  %p45_p1 = scmp.ne.s32.totalorder %s505_s8, %s501_s7 }
   0x9   : > { %p46_p2 = scmp.eq.s32.totalorder %s517_s11, 0  ;;  %p51_p3 = scmp.ne.s32.totalorder %s501_s7, %s497_s6 }
   0xa   : > { %s741_s14 = smov (%p31_p0, %s29_s14), 0  ;;  %p52_p5 = scmp.eq.s32.totalorder %s313_s12, 0 }
   0xb   : > { %p574_p4 = por %p46_p2, %p45_p1  ;;  %s33_s17 = ssub.s32 %s513_s10, %s741_s14 }
   0xc   : > { %p75_p6 = scmp.eq.s32.totalorder %s313_s12, 1  ;;  %p36_p7 = scmp.eq.s32.totalorder %s33_s17, 0 }
   0xd   : > { %p580_p8 = por %p52_p5, %p51_p3  ;;  %p81_p10 = scmp.eq.s32.totalorder %s314_s13, 1 }
   0xe   : > { %p584_p9 = por %p75_p6, %p45_p1  ;;  %p340_p13 = scmp.lt.s32.totalorder %s517_s11, 2 }
   0xf   : > { %s589_s20 = scalar_select %p36_p7, %s505_s8, %s38_s15  }
  0x10   : > { %s728_s19 = scalar_select %p584_p9, 1, 0 }
  0x11   : > { %p591_p11 = por %p81_p10, %p51_p3  ;;  %s101_s22 = sand.u32 1, %s505_s8  }
  0x12   : > { %s317_s23 = sshll.u32 %s101_s22, 3  ;;  %s327_s24 = sshll.u32 %s513_s10, 7 }
  0x13   : > { %s729_s21 = scalar_select %p591_p11, 1, 0 }
  0x14   : > { %s602_s27 = scalar_lea.hbm %s723_s0, %s327_s24  ;;  %s105_s28 = scalar_lea.vmem [#allocation2], %s317_s23 }
  0x15   : > { %s113_s29 = sshll.u32 %s105_s28, 4  ;;  %p608_p0 = pnand %p340_p13, %p574_p4  ;;  %s604_s29 = int_to_ptr.vmem [resolvable:$true] %s113_s29 }
  0x16   : > { %s613_s2 = scalar_lea.sflag [#allocation3], %s101_s22  ;;  %s405_s3 = scalar_lea.hbm %s602_s27, 128 }
  0x17   : > { %p406_p2 = scmp.ne.s32.totalorder %s602_s27, %s405_s3  ;;  %p407_p3 = pneg %p608_p0 }
  0x18   : > { %s410_s12 = scalar_lea.hbm %s723_s0, 256  ;;  %p411_p4 = scmp.lt.u32.totalorder %s602_s27, %s723_s0 }
  0x19   : > { %p408_p5 = pnand %p407_p3, %p406_p2  ;;  %p412_p7 = scmp.lt.u32.totalorder %s410_s12, %s405_s3 }
  0x1a   : > { %p414_p13 = scmp.lt.u32.totalorder %s405_s3, %s602_s27 }
  0x1b   : > { %p409_p6 = pneg %p408_p5  ;;  %p413_p10 = por %p412_p7, %p411_p4 }
  0x1d   : > { %p415_p12 = por %p414_p13, %p413_p10 }
  0x1f   : > { %p416_p1 = pnand %p415_p12, %p409_p6 }
  0x21   : > { %419 = shalt.err (!%p416_p1)
}
  0x22   : > { %s420_s16 = scalar_lea.vmem %s604_s29, 128  ;;  %s519_s17 = smov [#allocation2]  }
  0x23   : > { %p421_p2 = scmp.ne.s32.totalorder %s604_s29, %s420_s16  ;;  %s425_s22 = sshll.u32 %s519_s17, 4  ;;  %s426_s22 = int_to_ptr.vmem [resolvable:$false] %s425_s22 }
  0x24   : > { %s427_s23 = scalar_lea.vmem %s426_s22, 256  ;;  %p428_p9 = scmp.lt.s32.totalorder %s604_s29, %s426_s22 }
  0x25   : > { %p423_p5 = pnand %p421_p2, %p407_p3  ;;  %p429_p4 = scmp.lt.s32.totalorder %s427_s23, %s420_s16 }
  0x27   : > { %p424_p11 = pneg %p423_p5  ;;  %p430_p7 = por %p429_p4, %p428_p9 }
  0x29   : > { %p431_p10 = pnand %p430_p7, %p424_p11 }
  0x2b   : > { %434 = shalt.err (!%p431_p10)
}
  0x2c   : > { %s520_s24 = smov 32   ;;  %s521_s25 = smov 2  }
  0x2d   : > { %335 = dma.hbm_to_vmem [thread:$0]  (!%p608_p0), %s602_s27, 128, %s604_s29, %s613_s2, %s520_s24, %s520_s24, %s521_s25  }
  0x2e   : > { %p121_p12 = scmp.lt.s32.totalorder %s517_s11, 3  ;;  %p731_p1 = scmp.ge.s32.totalorder %s517_s11, 1 }
  0x30   : > { %p122_p3 = pnand %p731_p1, %p121_p12 }
  0x31   : > { %s645_s26 = sand.u32 (!%p122_p3), 1, %s501_s7  }
  0x32   : > { %125 = sbr.rel (%p122_p3) target bundleno = 137 (0x89), region = 24  ;;  %s321_s28 = sshll.u32 (!%p122_p3), %s645_s26, 3 }
  0x33   : > { %s128_s3 = scalar_lea.sflag (!%p122_p3), [#allocation3], %s645_s26  ;;  %s131_s4 = scalar_lea.vmem (!%p122_p3), [#allocation2], %s321_s28 }
  0x39   : > { %488 = dma.done.wait (%p580_p8), %s128_s3, 128  }
  0x3a   : > { %490 = vsyncadd (%p580_p8), %s128_s3, 4294967168  ;;  %vm159_vm0 = vcmask 1041408   ;;  %v155_v0 = vld [vmem:[%s131_s4] sm:$0x3]  ;;  %v156_v1 = vld [vmem:[%s131_s4 + $0x2] sm:$0x3]  ;;  %v212_v51 = vlaneseq }
  0x3b   : > { %v157_v2 = vld [vmem:[%s131_s4 + $0x4] sm:$0x3]  ;;  %v158_v3 = vld [vmem:[%s131_s4 + $0x6] sm:$0x3]  ;;  %v160_v4 = vsel %vm159_vm0, %v155_v0, -inf  ;;  %v161_v5 = vsel %vm159_vm0, %v156_v1, -inf }
  0x3c   : > { %v162_v6 = vsel %vm159_vm0, %v157_v2, -inf  ;;  %v163_v7 = vsel %vm159_vm0, %v158_v3, -inf  ;;  %v164_v8 = vmax.f32 %v160_v4, %v161_v5  ;;  %v213_v54 = vshrl.u32 %v212_v51, 7  ;;  %s324_s18 = sshll.u32 %s509_s9, 7  ;;  %s149_s27 = scalar_lea.vmem [#allocation5], %s321_s28 }
  0x3d   : > { %v165_v9 = vmax.f32 %v162_v6, %v163_v7  ;;  %s233_s29 = sshll.u32 %s149_s27, 4  ;;  %s674_s5 = scalar_lea.hbm %s724_s1, %s324_s18  ;;  %s676_s29 = int_to_ptr.vmem [resolvable:$true] %s233_s29 }
  0x3e   : > { %vm214_vm1 = vcmp.eq.s32.totalorder %v213_v54, 0  ;;  %s220_s12 = scalar_lea.sflag [#allocation4], %s645_s26  ;;  %s435_s13 = scalar_lea.vmem %s676_s29, 128 }
  0x3f   : > { %v166_v10 = vmax.f32 %v164_v8, %v165_v9  ;;  %p436_p8 = scmp.ne.s32.totalorder %s676_s29, %s435_s13  ;;  %p732_p9 = scmp.ne.s32.totalorder %s728_s19, 0 }
  0x40   : > { %s522_s9 = smov [#allocation5]  }
  0x41   : > { %v167_v11 = vsub.f32 %v155_v0, %v166_v10  ;;  %v168_v12 = vsub.f32 %v156_v1, %v166_v10  ;;  %v169_v13 = vsub.f32 %v157_v2, %v166_v10  ;;  %v170_v14 = vsub.f32 %v158_v3, %v166_v10  ;;  %p437_p11 = pnand %p436_p8, %p732_p9  ;;  %s439_s15 = sshll.u32 %s522_s9, 4  ;;  %s440_s15 = int_to_ptr.vmem [resolvable:$false] %s439_s15 }
  0x42   : > { %s441_s16 = scalar_lea.vmem %s440_s15, 256  ;;  %p442_p6 = scmp.lt.s32.totalorder %s676_s29, %s440_s15 }
  0x43   : > { %v171_v15 = vmul.f32 1.442695, %v167_v11  ;;  %v173_v16 = vmul.f32 1.442695, %v168_v12  ;;  %v175_v17 = vmul.f32 1.442695, %v169_v13  ;;  %p438_p0 = pneg %p437_p11  ;;  %p443_p13 = scmp.lt.s32.totalorder %s441_s16, %s435_s13 }
  0x44   : > { %v177_v18 = vmul.f32 1.442695, %v170_v14 }
  0x45   : > { %393 = vpow2.f32 %v171_v15  ;;  %p444_p2 = por %p443_p13, %p442_p6 }
  0x46   : > { %395 = vpow2.f32 %v173_v16 }
  0x47   : > { %397 = vpow2.f32 %v175_v17  ;;  %p445_p5 = pnand %p444_p2, %p438_p0 }
  0x48   : > { %399 = vpow2.f32 %v177_v18 }
  0x4f   : > { %v394_v19 = vpop.eup %393 }
  0x50   : > { %v396_v20 = vpop.eup %395  ;;  %v179_v21 = vsel %vm159_vm0, %v394_v19, 0.0  ;;  %v186_v30 = vmul.f32 %v394_v19, %v167_v11 }
  0x51   : > { %v398_v22 = vpop.eup %397  ;;  %v180_v23 = vsel %vm159_vm0, %v396_v20, 0.0  ;;  %v187_v31 = vmul.f32 %v396_v20, %v168_v12 }
  0x52   : > { %v400_v24 = vpop.eup %399  ;;  %v181_v25 = vadd.f32 %v180_v23, %v179_v21  ;;  %v182_v26 = vsel %vm159_vm0, %v398_v22, 0.0  ;;  %v188_v32 = vmul.f32 %v398_v22, %v169_v13  ;;  %v190_v33 = vsel %vm159_vm0, %v186_v30, 0.0 }
  0x53   : > { %v184_v27 = vsel %vm159_vm0, %v400_v24, 0.0  ;;  %v191_v34 = vsel %vm159_vm0, %v187_v31, 0.0  ;;  %v189_v36 = vmul.f32 %v400_v24, %v170_v14 }
  0x54   : > { %v183_v28 = vadd.f32 %v182_v26, %v181_v25  ;;  %v192_v35 = vadd.f32 %v191_v34, %v190_v33  ;;  %v193_v37 = vsel %vm159_vm0, %v188_v32, 0.0 }
  0x55   : > { %v195_v40 = vsel %vm159_vm0, %v189_v36, 0.0 }
  0x56   : > { %v185_v29 = vadd.f32 %v184_v27, %v183_v28  ;;  %v194_v38 = vadd.f32 %v193_v37, %v192_v35 }
  0x58   : > { %401 = vrcp.f32 %v185_v29  ;;  %v196_v43 = vadd.f32 %v195_v40, %v194_v38 }
  0x59   : > { %403 = vlog2.f32 %v185_v29 }
  0x62   : > { %v402_v39 = vpop.eup %401 }
  0x63   : > { %v198_v41 = vmul.f32 %v402_v39, %v185_v29  ;;  %v404_v42 = vpop.eup %403 }
  0x64   : > { %v202_v46 = vmul.f32 0.6931472, %v404_v42 }
  0x65   : > { %v199_v44 = vsub.f32 2.0, %v198_v41 }
  0x67   : > { %v200_v45 = vmul.f32 %v402_v39, %v199_v44 }
  0x69   : > { %v203_v47 = vmul.f32 %v200_v45, %v196_v43 }
  0x6b   : > { %v204_v48 = vsub.f32 %v202_v46, %v203_v47 }
  0x6d   : > { %v205_v49 = vsel %vm159_vm0, %v204_v48, 0.0 }
  0x6e   : > { %v206_v50 = vrot.slane %v205_v49, 4 }
  0x70   : > { %v207_v52 = vadd.f32 %v206_v50, %v205_v49 }
  0x72   : > { %v208_v53 = vrot.slane %v207_v52, 2 }
  0x74   : > { %v209_v55 = vadd.f32 %v208_v53, %v207_v52 }
  0x76   : > { %v210_v56 = vrot.slane %v209_v55, 1 }
  0x78   : > { %v211_v57 = vadd.f32 %v210_v56, %v209_v55 }
  0x7a   : > { %v215_v58 = vsel %vm214_vm1, %v211_v57, 0.0 }
  0x7b   : > { %218 = vst [vmem:[%s149_s27] sm:$0xff] %v215_v58 }
  0x7c   : > { %448 = shalt.err (!%p445_p5)
}
  0x7d   : > { %s449_s17 = scalar_lea.hbm %s674_s5, 128  ;;  %s453_s24 = scalar_lea.hbm %s724_s1, 256 }
  0x7e   : > { %p450_p4 = scmp.ne.s32.totalorder %s674_s5, %s449_s17  ;;  %p454_p12 = scmp.lt.u32.totalorder %s674_s5, %s724_s1 }
  0x7f   : > { %p455_p1 = scmp.lt.u32.totalorder %s453_s24, %s449_s17  ;;  %p457_p8 = scmp.lt.u32.totalorder %s449_s17, %s674_s5 }
  0x80   : > { %p451_p7 = pnand %p450_p4, %p732_p9 }
  0x81   : > { %p456_p3 = por %p455_p1, %p454_p12 }
  0x82   : > { %p452_p10 = pneg %p451_p7 }
  0x83   : > { %p458_p11 = por %p457_p8, %p456_p3 }
  0x85   : > { %p459_p0 = pnand %p458_p11, %p452_p10 }
  0x87   : > { %462 = shalt.err (!%p459_p0)
}
  0x88   : > { %330 = dma.vmem_to_hbm [thread:$0]  (%p732_p9), %s676_s29, 128, %s674_s5, %s220_s12  }
  0x89 PF: > { %s245_s28 = sand.u32 1, %s497_s6   ;;  %p733_p6 = scmp.ne.s32.totalorder %s729_s21, 0 }
  0x8a   : > { %p734_p13 = scmp.ge.s32.totalorder %s517_s11, 2  ;;  %s246_s3 = scalar_lea.sflag [#allocation4], %s245_s28 }
  0x8c   : > { %p337_p2 = pnand %p734_p13, %p733_p6 }
  0x8e   : > { %492 = dma.done.wait (!%p337_p2), %s246_s3, 128  }
  0x8f   : > { %494 = vsyncadd (!%p337_p2), %s246_s3, 4294967168  ;;  %s17_s11 = sadd.s32 1, %s517_s11   ;;  %s735_s6 = smov %s501_s7 }
  0x90   : > { %p14_p5 = scmp.ge.s32.totalorder %s17_s11, 4   ;;  %s736_s7 = smov %s505_s8 }
  0x91   : > { %s737_s8 = smov %s589_s20  ;;  %s738_s9 = smov %s513_s10 }
  0x92   : > { %s739_s10 = smov %s741_s14  ;;  %16 = sbr.rel (!%p14_p5) target bundleno = 6 (0x6), region = 73 }
  0x99   :  { %251 = vsyncpa [#allocation3], 1 }
  0x9a   :  { %253 = vsyncpa [#allocation3 + $0x1], 1 }
  0x9b   :  { %254 = vsyncpa [#allocation4], 1 }
  0x9c   :  { %256 = vsyncpa [#allocation4 + $0x1], 1 }

</bundles_post_ra>
